<compile_context>
chip_gen: v7x
topology: tpu7x:2x2x1
jax: 0.10.0
libtpu: 0.0.40
codegen_flags: <defaults>
</compile_context>

<pallas_src>
import numpy as np
import jax
import jax.numpy as jnp
from jax.experimental import pallas as pl
from jax.experimental.pallas import tpu as pltpu

# -------------------- configuration (small synthetic shapes) -----------------
BATCH = 2
IMG_H, IMG_W = 14, 14          # raw image size (before ImageList padding)
SIZE_DIV = 8                   # cfg.MODEL.MASK_FORMER.SIZE_DIVISIBILITY
PATCH = 4                      # backbone stand-in downsampling stride
EMBED = 32                     # mask-embedding / feature channels
NUM_QUERIES = 8                # cfg.MODEL.MASK_FORMER.NUM_OBJECT_QUERIES
NUM_CLASSES = 5                # head classes (pred_logits has NUM_CLASSES+1)
TOPK = 4                       # cfg.TEST.DETECTIONS_PER_IMAGE
OUT_H, OUT_W = 20, 20          # requested output resolution per image
STATS_W = 128                  # lane-dense width of the packed per-query stats


# ------------------------------ host-side helpers -----------------------------
def bilinear_matrix(out_size, in_size):
    """1-D interpolation matrix matching F.interpolate(mode='bilinear',
    align_corners=False) along one axis."""
    m = np.zeros((out_size, in_size), np.float32)
    scale = in_size / out_size
    for i in range(out_size):
        src = (i + 0.5) * scale - 0.5
        src = max(src, 0.0)
        i0 = min(int(np.floor(src)), in_size - 1)
        i1 = min(i0 + 1, in_size - 1)
        w1 = src - i0
        m[i, i0] += 1.0 - w1
        m[i, i1] += w1
    return m


def composed_resize_matrix(H4, W4, Hp, Wp, h_img, w_img, out_h, out_w):
    """Linear map (T = H4*W4) -> (out_h*out_w) equal to:
       resize (H4,W4)->(Hp,Wp), crop to (h_img,w_img), resize -> (out_h,out_w).
       Returned as (T, out_h*out_w) so that masks_up = mask_tokens @ M."""
    L1 = bilinear_matrix(Hp, H4)              # (Hp, H4)
    R1 = bilinear_matrix(Wp, W4)              # (Wp, W4)
    L2 = bilinear_matrix(out_h, h_img)        # (out_h, h_img)
    R2 = bilinear_matrix(out_w, w_img)        # (out_w, w_img)
    # crop BEFORE composing (crop then resize == slice rows/cols of stage 1)
    LT = L2 @ L1[:h_img, :]                   # (out_h, H4)
    RTt = R2 @ R1[:w_img, :]                  # (out_w, W4)   (== RT.T)
    A = np.kron(LT, RTt)                      # (out_h*out_w, H4*W4)
    return np.ascontiguousarray(A.T.astype(np.float32))       # (T, out_h*out_w)


def init_params(key):
    ks = jax.random.split(key, 5)
    return {
        "pixel_mean": jnp.array([123.675, 116.28, 103.53], jnp.float32),
        "pixel_std": jnp.array([58.395, 57.12, 57.375], jnp.float32),
        "w_patch": 0.05 * jax.random.normal(ks[0], (3 * PATCH * PATCH, EMBED), jnp.float32),
        "w_pool": 0.05 * jax.random.normal(ks[1], (EMBED, EMBED), jnp.float32),
        "query_embed": 0.05 * jax.random.normal(ks[2], (NUM_QUERIES, EMBED), jnp.float32),
        "w_cls": 0.05 * jax.random.normal(ks[3], (EMBED, NUM_CLASSES + 1), jnp.float32),
        "w_mask": 0.05 * jax.random.normal(ks[4], (EMBED, EMBED), jnp.float32),
    }


# ------------------------------ fused Pallas kernel ----------------------------
def build_fused_head_call(B, T, Cin, Q, C1, E, OHW, SW=STATS_W):
    """Single kernel per batch element: backbone stand-in + head + resize +
    softmax + mask scoring.  Only top-k selection happens outside."""
    C = C1 - 1

    def kernel(xp_ref, wpe_ref, bias_ref, wpool_ref, qemb_ref, whead_ref,
               rz_ref, stats_ref, masks_ref):
        # ---- backbone / head stand-in (all in VMEM) ----
        feat = jnp.dot(xp_ref[0], wpe_ref[...],
                       preferred_element_type=jnp.float32) + bias_ref[...]     # (T, E)
        pooled = jnp.mean(feat, axis=0, keepdims=True)                         # (1, E)
        pooled = jnp.dot(pooled, wpool_ref[...],
                         preferred_element_type=jnp.float32)                   # (1, E)
        qfeat = qemb_ref[...] + pooled                                         # (Q, E)
        head = jnp.dot(qfeat, whead_ref[...],
                       preferred_element_type=jnp.float32)                     # (Q, C1+E)
        logits = head[:, :C1]                                                  # (Q, C+1)
        memb = head[:, C1:]                                                    # (Q, E)

        # mask logits at token resolution: memb @ feat^T (contract E)
        pm = jax.lax.dot_general(memb, feat, (((1,), (1,)), ((), ())),
                                 preferred_element_type=jnp.float32)           # (Q, T)

        # composed crop + double bilinear resize -> one lane-dense matmul
        up = jnp.dot(pm, rz_ref[0], preferred_element_type=jnp.float32)        # (Q, OH*OW)

        # ---- instance_inference per-query math ----
        binm = (up > 0.0).astype(jnp.float32)
        sig = pl.reciprocal(1.0 + jnp.exp(-up), approx=True)                   # sigmoid
        num = jnp.sum(sig * binm, axis=1, keepdims=True)
        den = jnp.sum(binm, axis=1, keepdims=True) + 1e-6
        mask_score = num * pl.reciprocal(den, approx=True)                     # (Q, 1)

        mx = jnp.max(logits, axis=-1, keepdims=True)
        e = jnp.exp(logits - mx)
        probs = e * pl.reciprocal(jnp.sum(e, axis=-1, keepdims=True), approx=True)
        scores = probs[:, :C]                                                  # (Q, C)

        # ---- packed, lane-dense per-query stats: [scores | mask_score | memb | 0] ----
        stats_ref[0] = jnp.zeros((Q, SW), jnp.float32)
        stats_ref[0, :, 0:C] = scores
        stats_ref[0, :, C:C + 1] = mask_score
        stats_ref[0, :, C + 1:C + 1 + E] = memb
        masks_ref[0] = binm                                                    # (Q, OH*OW)

    return pl.pallas_call(
        kernel,
        out_shape=(
            jax.ShapeDtypeStruct((B, Q, SW), jnp.float32),     # packed stats
            jax.ShapeDtypeStruct((B, Q, OHW), jnp.float32),    # binary masks (flat spatial)
        ),
        grid=(B,),
        in_specs=[
            pl.BlockSpec((1, T, Cin), lambda i: (i, 0, 0)),    # patch tokens
            pl.BlockSpec((Cin, E), lambda i: (0, 0)),          # folded patch weight
            pl.BlockSpec((1, E), lambda i: (0, 0)),            # folded patch bias
            pl.BlockSpec((E, E), lambda i: (0, 0)),            # w_pool
            pl.BlockSpec((Q, E), lambda i: (0, 0)),            # query embeddings
            pl.BlockSpec((E, C1 + E), lambda i: (0, 0)),       # [w_cls | w_mask]
            pl.BlockSpec((1, T, OHW), lambda i: (i, 0, 0)),    # composed resize matrix
        ],
        out_specs=(
            pl.BlockSpec((1, Q, SW), lambda i: (i, 0, 0)),
            pl.BlockSpec((1, Q, OHW), lambda i: (i, 0, 0)),
        ),
        compiler_params=pltpu.CompilerParams(
            dimension_semantics=("parallel",)),
    )


# ------------------------------ MaskFormer forward -----------------------------
def maskformer_forward(batched_inputs, params):
    B = len(batched_inputs)
    image_sizes = [(int(bi["image"].shape[-2]), int(bi["image"].shape[-1]))
                   for bi in batched_inputs]
    out_sizes = [(int(bi.get("height", sz[0])), int(bi.get("width", sz[1])))
                 for bi, sz in zip(batched_inputs, image_sizes)]
    # TODO(synk): ragged per-image sizes would require per-size grouping.
    assert all(sz == image_sizes[0] for sz in image_sizes)
    assert all(sz == out_sizes[0] for sz in out_sizes)
    h_img, w_img = image_sizes[0]
    out_h, out_w = out_sizes[0]

    # ---- ImageList.from_tensors: pad to size_divisibility ----
    Hp = int(np.ceil(h_img / SIZE_DIV) * SIZE_DIV)
    Wp = int(np.ceil(w_img / SIZE_DIV) * SIZE_DIV)
    H4, W4 = Hp // PATCH, Wp // PATCH
    T = H4 * W4
    Cin = 3 * PATCH * PATCH

    imgs = jnp.stack([bi["image"] for bi in batched_inputs]).astype(jnp.float32)
    # Pad the RAW image with the per-channel mean so the normalization folded
    # into w_patch maps padded pixels to exactly 0 (== normalize-then-zero-pad).
    canvas = jnp.broadcast_to(params["pixel_mean"].reshape(1, 3, 1, 1),
                              (B, 3, Hp, Wp))
    padded = canvas.at[:, :, :h_img, :w_img].set(imgs)

    # ---- patchify (cheap data movement, plain JAX) ----
    xp = padded.reshape(B, 3, H4, PATCH, W4, PATCH)
    xp = jnp.transpose(xp, (0, 2, 4, 1, 3, 5)).reshape(B, T, Cin)

    # ---- fold (x - mean) / std into the patch-embed weight + bias ----
    pp = PATCH * PATCH
    std_tok = jnp.repeat(params["pixel_std"], pp)[:, None]      # (Cin, 1)
    mean_tok = jnp.repeat(params["pixel_mean"], pp)[None, :]    # (1, Cin)
    w_patch_eff = params["w_patch"] / std_tok                   # (Cin, E)
    bias_patch = -(mean_tok @ w_patch_eff)                      # (1, E)

    # ---- concatenated class + mask head weight ----
    w_head = jnp.concatenate([params["w_cls"], params["w_mask"]], axis=1)

    # ---- composed crop + double bilinear resize matrices (host, exact) ----
    rz = np.stack([
        composed_resize_matrix(H4, W4, Hp, Wp, h, w, oh, ow)
        for (h, w), (oh, ow) in zip(image_sizes, out_sizes)
    ])                                                           # (B, T, OH*OW)
    rz = jnp.asarray(rz)

    # ---- single fused Pallas call (grid over batch) ----
    fused = build_fused_head_call(B, T, Cin, NUM_QUERIES, NUM_CLASSES + 1,
                                  EMBED, out_h * out_w)
    stats, masks_flat = fused(xp, w_patch_eff, bias_patch, params["w_pool"],
                              params["query_embed"], w_head, rz)
    masks = masks_flat.reshape(B, NUM_QUERIES, out_h, out_w)

    # ---- per-image instance_inference tail (top-k has no Pallas equivalent) ----
    C = NUM_CLASSES
    processed_results = []
    for b in range(B):
        st = stats[b]
        scores = st[:, :C]                                # (Q, C)
        mask_scores = st[:, C]                            # (Q,)
        mask_embed = st[:, C + 1:C + 1 + EMBED]           # (Q, E)
        scores_per_image, topk_idx = jax.lax.top_k(scores.reshape(-1), TOPK)
        labels_per_image = topk_idx % C
        query_idx = topk_idx // C
        inst = {
            "pred_masks": masks[b][query_idx],            # (K, out_h, out_w)
            "mask_embed": mask_embed[query_idx],          # (K, E)
            "score_dist": scores[query_idx],              # (K, C)
            "scores": scores_per_image * mask_scores[query_idx],
            "pred_classes": labels_per_image,
        }
        processed_results.append({"instances": inst})
    return processed_results


# ---------------------------------- main ---------------------------------------
if __name__ == "__main__":
    key = jax.random.PRNGKey(0)
    k_params, k_img = jax.random.split(key)
    params = init_params(k_params)

    img_keys = jax.random.split(k_img, BATCH)
    batched_inputs = [
        {
            "image": jax.random.uniform(img_keys[i], (3, IMG_H, IMG_W),
                                        minval=0.0, maxval=255.0, dtype=jnp.float32),
            "height": OUT_H,
            "width": OUT_W,
        }
        for i in range(BATCH)
    ]

    results = maskformer_forward(batched_inputs, params)
    jax.block_until_ready(results)

    # quick sanity on output contract
    inst0 = results[0]["instances"]
    assert inst0["pred_masks"].shape == (TOPK, OUT_H, OUT_W)
    assert inst0["mask_embed"].shape == (TOPK, EMBED)
    assert inst0["score_dist"].shape == (TOPK, NUM_CLASSES)
    assert inst0["scores"].shape == (TOPK,)
    assert inst0["pred_classes"].shape == (TOPK,)
    assert bool(jnp.all((inst0["pred_masks"] == 0.0) | (inst0["pred_masks"] == 1.0)))
    print("KERNEL_OK")
</pallas_src>

<mosaic_0001>
module attributes {stable_mosaic.version = 11 : i64} {
  func.func @kernel(%arg0: i32, %arg1: memref<1x16x48xf32, #tpu.memory_space<vmem>>, %arg2: memref<48x32xf32, #tpu.memory_space<vmem>>, %arg3: memref<1x32xf32, #tpu.memory_space<vmem>>, %arg4: memref<32x32xf32, #tpu.memory_space<vmem>>, %arg5: memref<8x32xf32, #tpu.memory_space<vmem>>, %arg6: memref<32x38xf32, #tpu.memory_space<vmem>>, %arg7: memref<1x16x400xf32, #tpu.memory_space<vmem>>, %arg8: memref<1x8x128xf32, #tpu.memory_space<vmem>>, %arg9: memref<1x8x400xf32, #tpu.memory_space<vmem>>) attributes {dimension_semantics = [#tpu.dimension_semantics<parallel>], iteration_bounds = array<i64: 2>, scalar_prefetch = 0 : i64, scratch_operands = 0 : i64, tpu.core_type = #tpu.core_type<tc>, window_params = [{transform_indices = @transform_0, window_bounds = array<i64: 1, 16, 48>}, {pipeline_mode = #tpu.pipeline_mode<synchronous>, transform_indices = @transform_1, window_bounds = array<i64: 48, 32>}, {pipeline_mode = #tpu.pipeline_mode<synchronous>, transform_indices = @transform_2, window_bounds = array<i64: 1, 32>}, {pipeline_mode = #tpu.pipeline_mode<synchronous>, transform_indices = @transform_3, window_bounds = array<i64: 32, 32>}, {pipeline_mode = #tpu.pipeline_mode<synchronous>, transform_indices = @transform_4, window_bounds = array<i64: 8, 32>}, {pipeline_mode = #tpu.pipeline_mode<synchronous>, transform_indices = @transform_5, window_bounds = array<i64: 32, 38>}, {transform_indices = @transform_6, window_bounds = array<i64: 1, 16, 400>}, {transform_indices = @transform_7, window_bounds = array<i64: 1, 8, 128>}, {transform_indices = @transform_8, window_bounds = array<i64: 1, 8, 400>}]} {
    %c0 = arith.constant 0 : index
    %c0_0 = arith.constant 0 : index
    %c0_1 = arith.constant 0 : index
    %0 = vector.load %arg1[%c0, %c0_0, %c0_1] : memref<1x16x48xf32, #tpu.memory_space<vmem>>, vector<1x16x48xf32>
    %1 = vector.shape_cast %0 : vector<1x16x48xf32> to vector<16x48xf32>
    %c0_2 = arith.constant 0 : index
    %c0_3 = arith.constant 0 : index
    %2 = vector.load %arg2[%c0_2, %c0_3] : memref<48x32xf32, #tpu.memory_space<vmem>>, vector<48x32xf32>
    %cst = arith.constant dense<0.000000e+00> : vector<16x32xf32>
    %3 = tpu.matmul %1, %2, %cst {dimension_numbers = #tpu.dot_dimension_numbers<[1], [0], [0], [1], [0, 0, 1, 1], [], []>} : vector<16x48xf32>, vector<48x32xf32>, vector<16x32xf32> -> vector<16x32xf32>
    %c0_4 = arith.constant 0 : index
    %c0_5 = arith.constant 0 : index
    %4 = vector.load %arg3[%c0_4, %c0_5] : memref<1x32xf32, #tpu.memory_space<vmem>>, vector<1x32xf32>
    %5 = vector.broadcast %4 : vector<1x32xf32> to vector<16x32xf32>
    %6 = arith.addf %3, %5 : vector<16x32xf32>
    %cst_6 = arith.constant dense<0.000000e+00> : vector<32xf32>
    %7 = vector.multi_reduction <add>, %6, %cst_6 [0] : vector<16x32xf32> to vector<32xf32>
    %8 = vector.shape_cast %7 : vector<32xf32> to vector<1x32xf32>
    %cst_7 = arith.constant 1.600000e+01 : f32
    %9 = vector.broadcast %cst_7 : f32 to vector<1x32xf32>
    %10 = arith.divf %8, %9 : vector<1x32xf32>
    %c0_8 = arith.constant 0 : index
    %c0_9 = arith.constant 0 : index
    %11 = vector.load %arg4[%c0_8, %c0_9] : memref<32x32xf32, #tpu.memory_space<vmem>>, vector<32x32xf32>
    %cst_10 = arith.constant dense<0.000000e+00> : vector<1x32xf32>
    %12 = tpu.matmul %10, %11, %cst_10 {dimension_numbers = #tpu.dot_dimension_numbers<[1], [0], [0], [1], [0, 0, 1, 1], [], []>} : vector<1x32xf32>, vector<32x32xf32>, vector<1x32xf32> -> vector<1x32xf32>
    %c0_11 = arith.constant 0 : index
    %c0_12 = arith.constant 0 : index
    %13 = vector.load %arg5[%c0_11, %c0_12] : memref<8x32xf32, #tpu.memory_space<vmem>>, vector<8x32xf32>
    %14 = vector.broadcast %12 : vector<1x32xf32> to vector<8x32xf32>
    %15 = arith.addf %13, %14 : vector<8x32xf32>
    %c0_13 = arith.constant 0 : index
    %c0_14 = arith.constant 0 : index
    %16 = vector.load %arg6[%c0_13, %c0_14] : memref<32x38xf32, #tpu.memory_space<vmem>>, vector<32x38xf32>
    %cst_15 = arith.constant dense<0.000000e+00> : vector<8x38xf32>
    %17 = tpu.matmul %15, %16, %cst_15 {dimension_numbers = #tpu.dot_dimension_numbers<[1], [0], [0], [1], [0, 0, 1, 1], [], []>} : vector<8x32xf32>, vector<32x38xf32>, vector<8x38xf32> -> vector<8x38xf32>
    %18 = vector.extract_strided_slice %17 {offsets = [0, 0], sizes = [8, 6], strides = [1, 1]} : vector<8x38xf32> to vector<8x6xf32>
    %19 = vector.extract_strided_slice %17 {offsets = [0, 6], sizes = [8, 32], strides = [1, 1]} : vector<8x38xf32> to vector<8x32xf32>
    %cst_16 = arith.constant dense<0.000000e+00> : vector<8x16xf32>
    %20 = tpu.matmul %19, %6, %cst_16 {dimension_numbers = #tpu.dot_dimension_numbers<[1], [1], [0], [0], [0, 0, 1, 0], [], []>} : vector<8x32xf32>, vector<16x32xf32>, vector<8x16xf32> -> vector<8x16xf32>
    %c0_17 = arith.constant 0 : index
    %c0_18 = arith.constant 0 : index
    %c0_19 = arith.constant 0 : index
    %21 = vector.load %arg7[%c0_17, %c0_18, %c0_19] : memref<1x16x400xf32, #tpu.memory_space<vmem>>, vector<1x16x400xf32>
    %22 = vector.shape_cast %21 : vector<1x16x400xf32> to vector<16x400xf32>
    %cst_20 = arith.constant dense<0.000000e+00> : vector<8x400xf32>
    %23 = tpu.matmul %20, %22, %cst_20 {dimension_numbers = #tpu.dot_dimension_numbers<[1], [0], [0], [1], [0, 0, 1, 1], [], []>} : vector<8x16xf32>, vector<16x400xf32>, vector<8x400xf32> -> vector<8x400xf32>
    %cst_21 = arith.constant 0.000000e+00 : f32
    %24 = vector.broadcast %cst_21 : f32 to vector<8x400xf32>
    %25 = arith.cmpf ogt, %23, %24 : vector<8x400xf32>
    %26 = arith.extui %25 : vector<8x400xi1> to vector<8x400xi32>
    %27 = arith.sitofp %26 : vector<8x400xi32> to vector<8x400xf32>
    %cst_22 = arith.constant 0.000000e+00 : f32
    %28 = vector.broadcast %cst_22 : f32 to vector<8x400xf32>
    %29 = arith.subf %28, %23 : vector<8x400xf32>
    %30 = math.exp %29 : vector<8x400xf32>
    %cst_23 = arith.constant 1.000000e+00 : f32
    %31 = vector.broadcast %cst_23 : f32 to vector<8x400xf32>
    %32 = arith.addf %31, %30 : vector<8x400xf32>
    %33 = tpu.reciprocal %32 {approx = true} : vector<8x400xf32> -> vector<8x400xf32>
    %34 = arith.mulf %33, %27 : vector<8x400xf32>
    %cst_24 = arith.constant dense<0.000000e+00> : vector<8xf32>
    %35 = vector.multi_reduction <add>, %34, %cst_24 [1] : vector<8x400xf32> to vector<8xf32>
    %36 = vector.shape_cast %35 : vector<8xf32> to vector<8x1xf32>
    %cst_25 = arith.constant dense<0.000000e+00> : vector<8xf32>
    %37 = vector.multi_reduction <add>, %27, %cst_25 [1] : vector<8x400xf32> to vector<8xf32>
    %38 = vector.shape_cast %37 : vector<8xf32> to vector<8x1xf32>
    %cst_26 = arith.constant 9.99999997E-7 : f32
    %39 = vector.broadcast %cst_26 : f32 to vector<8x1xf32>
    %40 = arith.addf %38, %39 : vector<8x1xf32>
    %41 = tpu.reciprocal %40 {approx = true} : vector<8x1xf32> -> vector<8x1xf32>
    %42 = arith.mulf %36, %41 : vector<8x1xf32>
    %cst_27 = arith.constant dense<0xFF800000> : vector<8xf32>
    %43 = vector.multi_reduction <maximumf>, %18, %cst_27 [1] : vector<8x6xf32> to vector<8xf32>
    %44 = vector.shape_cast %43 : vector<8xf32> to vector<8x1xf32>
    %45 = vector.broadcast %44 : vector<8x1xf32> to vector<8x6xf32>
    %46 = arith.subf %18, %45 : vector<8x6xf32>
    %47 = math.exp %46 : vector<8x6xf32>
    %cst_28 = arith.constant dense<0.000000e+00> : vector<8xf32>
    %48 = vector.multi_reduction <add>, %47, %cst_28 [1] : vector<8x6xf32> to vector<8xf32>
    %49 = vector.shape_cast %48 : vector<8xf32> to vector<8x1xf32>
    %50 = tpu.reciprocal %49 {approx = true} : vector<8x1xf32> -> vector<8x1xf32>
    %51 = vector.broadcast %50 : vector<8x1xf32> to vector<8x6xf32>
    %52 = arith.mulf %47, %51 : vector<8x6xf32>
    %53 = vector.extract_strided_slice %52 {offsets = [0, 0], sizes = [8, 5], strides = [1, 1]} : vector<8x6xf32> to vector<8x5xf32>
    %cst_29 = arith.constant 0.000000e+00 : f32
    %54 = vector.broadcast %cst_29 : f32 to vector<8x128xf32>
    %c0_30 = arith.constant 0 : index
    %c0_31 = arith.constant 0 : index
    %c0_32 = arith.constant 0 : index
    %55 = vector.load %arg8[%c0_30, %c0_31, %c0_32] : memref<1x8x128xf32, #tpu.memory_space<vmem>>, vector<1x8x128xf32>
    %56 = vector.shape_cast %55 : vector<1x8x128xf32> to vector<8x128xf32>
    %57 = vector.shape_cast %54 : vector<8x128xf32> to vector<1x8x128xf32>
    tpu.vector_store %arg8[%c0_30, %c0_31, %c0_32], %57 {strides = array<i32>} : memref<1x8x128xf32, #tpu.memory_space<vmem>>, vector<1x8x128xf32>,
    %c0_33 = arith.constant 0 : index
    %c0_34 = arith.constant 0 : index
    %c0_35 = arith.constant 0 : index
    %58 = vector.load %arg8[%c0_33, %c0_34, %c0_35] : memref<1x8x128xf32, #tpu.memory_space<vmem>>, vector<1x8x5xf32>
    %59 = vector.shape_cast %58 : vector<1x8x5xf32> to vector<8x5xf32>
    %60 = vector.shape_cast %53 : vector<8x5xf32> to vector<1x8x5xf32>
    tpu.vector_store %arg8[%c0_33, %c0_34, %c0_35], %60 {strides = array<i32>} : memref<1x8x128xf32, #tpu.memory_space<vmem>>, vector<1x8x5xf32>,
    %c0_36 = arith.constant 0 : index
    %c0_37 = arith.constant 0 : index
    %c5 = arith.constant 5 : index
    %61 = vector.load %arg8[%c0_36, %c0_37, %c5] : memref<1x8x128xf32, #tpu.memory_space<vmem>>, vector<1x8x1xf32>
    %62 = vector.shape_cast %61 : vector<1x8x1xf32> to vector<8x1xf32>
    %63 = vector.shape_cast %42 : vector<8x1xf32> to vector<1x8x1xf32>
    tpu.vector_store %arg8[%c0_36, %c0_37, %c5], %63 {strides = array<i32>} : memref<1x8x128xf32, #tpu.memory_space<vmem>>, vector<1x8x1xf32>,
    %c0_38 = arith.constant 0 : index
    %c0_39 = arith.constant 0 : index
    %c6 = arith.constant 6 : index
    %64 = vector.load %arg8[%c0_38, %c0_39, %c6] : memref<1x8x128xf32, #tpu.memory_space<vmem>>, vector<1x8x32xf32>
    %65 = vector.shape_cast %64 : vector<1x8x32xf32> to vector<8x32xf32>
    %66 = vector.shape_cast %19 : vector<8x32xf32> to vector<1x8x32xf32>
    tpu.vector_store %arg8[%c0_38, %c0_39, %c6], %66 {strides = array<i32>} : memref<1x8x128xf32, #tpu.memory_space<vmem>>, vector<1x8x32xf32>,
    %c0_40 = arith.constant 0 : index
    %c0_41 = arith.constant 0 : index
    %c0_42 = arith.constant 0 : index
    %67 = vector.load %arg9[%c0_40, %c0_41, %c0_42] : memref<1x8x400xf32, #tpu.memory_space<vmem>>, vector<1x8x400xf32>
    %68 = vector.shape_cast %67 : vector<1x8x400xf32> to vector<8x400xf32>
    %69 = vector.shape_cast %27 : vector<8x400xf32> to vector<1x8x400xf32>
    tpu.vector_store %arg9[%c0_40, %c0_41, %c0_42], %69 {strides = array<i32>} : memref<1x8x400xf32, #tpu.memory_space<vmem>>, vector<1x8x400xf32>,
    return
  }
  func.func @transform_0(%arg0: i32) -> (i32, i32, i32) {
    %c0_i32 = arith.constant 0 : i32
    %c0_i32_0 = arith.constant 0 : i32
    %c0_i32_1 = arith.constant 0 : i32
    return %arg0, %c0_i32, %c0_i32_0 : i32, i32, i32
  }
  func.func @transform_1(%arg0: i32) -> (i32, i32) {
    %c0_i32 = arith.constant 0 : i32
    %c0_i32_0 = arith.constant 0 : i32
    %c0_i32_1 = arith.constant 0 : i32
    return %c0_i32, %c0_i32_0 : i32, i32
  }
  func.func @transform_2(%arg0: i32) -> (i32, i32) {
    %c0_i32 = arith.constant 0 : i32
    %c0_i32_0 = arith.constant 0 : i32
    %c0_i32_1 = arith.constant 0 : i32
    return %c0_i32, %c0_i32_0 : i32, i32
  }
  func.func @transform_3(%arg0: i32) -> (i32, i32) {
    %c0_i32 = arith.constant 0 : i32
    %c0_i32_0 = arith.constant 0 : i32
    %c0_i32_1 = arith.constant 0 : i32
    return %c0_i32, %c0_i32_0 : i32, i32
  }
  func.func @transform_4(%arg0: i32) -> (i32, i32) {
    %c0_i32 = arith.constant 0 : i32
    %c0_i32_0 = arith.constant 0 : i32
    %c0_i32_1 = arith.constant 0 : i32
    return %c0_i32, %c0_i32_0 : i32, i32
  }
  func.func @transform_5(%arg0: i32) -> (i32, i32) {
    %c0_i32 = arith.constant 0 : i32
    %c0_i32_0 = arith.constant 0 : i32
    %c0_i32_1 = arith.constant 0 : i32
    return %c0_i32, %c0_i32_0 : i32, i32
  }
  func.func @transform_6(%arg0: i32) -> (i32, i32, i32) {
    %c0_i32 = arith.constant 0 : i32
    %c0_i32_0 = arith.constant 0 : i32
    %c0_i32_1 = arith.constant 0 : i32
    return %arg0, %c0_i32, %c0_i32_0 : i32, i32, i32
  }
  func.func @transform_7(%arg0: i32) -> (i32, i32, i32) {
    %c0_i32 = arith.constant 0 : i32
    %c0_i32_0 = arith.constant 0 : i32
    %c0_i32_1 = arith.constant 0 : i32
    return %arg0, %c0_i32, %c0_i32_0 : i32, i32, i32
  }
  func.func @transform_8(%arg0: i32) -> (i32, i32, i32) {
    %c0_i32 = arith.constant 0 : i32
    %c0_i32_0 = arith.constant 0 : i32
    %c0_i32_1 = arith.constant 0 : i32
    return %arg0, %c0_i32, %c0_i32_0 : i32, i32, i32
  }
}

</mosaic_0001>

<bundles_post_ra>
// kernel: tpu_custom_call.1
= control target key start
LH: loop header
LB: loop body
LE: loop exit
PB: predicated region body
PF: predicated region fallthrough
CT: control target
= control target key end

     0   :  { %14 = vsyncpa [#allocation3], 0  ;;  %s1886_s0 = inlined_call_operand.vmem [shape: f32[2,16,48], index: 0, kind: input, shape index: {}]   ;;  %s1887_s1 = inlined_call_operand.vmem [shape: f32[48,32], index: 1, kind: input, shape index: {}]   ;;  %s1888_s2 = inlined_call_operand.vmem [shape: f32[1,32], index: 2, kind: input, shape index: {}]   ;;  %s1889_s3 = inlined_call_operand.vmem [shape: f32[32,32], index: 3, kind: input, shape index: {}]   ;;  %s1890_s4 = inlined_call_operand.hbm [shape: f32[8,32], index: 4, kind: input, shape index: {}]   ;;  %s1891_s5 = inlined_call_operand.vmem [shape: f32[32,38], index: 5, kind: input, shape index: {}]   ;;  %s1892_s6 = inlined_call_operand.hbm [shape: f32[2,16,400], index: 6, kind: input, shape index: {}]   ;;  %s1893_s7 = inlined_call_operand.hbm [shape: f32[2,8,128], index: 7, kind: output, shape index: {0}]   ;;  %s1894_s8 = inlined_call_operand.hbm [shape: f32[2,8,400], index: 8, kind: output, shape index: {1}]  }
   0x1   :  { %15 = vsyncpa [#allocation6], 0 }
   0x2   :  { %17 = vsyncpa [#allocation6 + $0x1], 0 }
   0x3   :  { %18 = vsyncpa [#allocation4], 0 }
   0x4   :  { %20 = vsyncpa [#allocation4 + $0x1], 0 }
   0x5   :  { %21 = vsyncpa [#allocation9], 0 }
   0x6   :  { %23 = vsyncpa [#allocation9 + $0x1], 0  ;;  %s1551_s27 = smov 0   ;;  %s1553_s28 = smov 0  }
   0x7   :  { %s1555_s29 = smov 0   ;;  %s1557_s30 = smov 0  }
   0x8 LB: > { %1903 = sst [smem:[#allocation14_spill]] %s1490_s29  ;;  %s1572_s9 = sadd.s32 4294967295, %s1494_s30   ;;  %s1494_s30 = sphi %s1557_s30, %s1922_s30   ;;  %s1490_s29 = sphi %s1555_s29, %s1924_s29   ;;  %s1486_s28 = sphi %s1553_s28, %s1926_s28   ;;  %s1482_s27 = sphi %s1551_s27, %s1925_s27  }
   0x9   : > { %s1105_s10 = sadd.s32 4294967294, %s1494_s30   ;;  %s1576_s11 = sadd.s32 1, %s1494_s30  }
   0xa   : > { %1904 = sst [smem:[#allocation15_spill]] %s1576_s11  ;;  %s167_s12 = sadd.s32 1, %s1490_s29 }
   0xb   : > { %s164_s13 = ssub.s32 %s1494_s30, %s1576_s11  ;;  %p174_p0 = scmp.ne.s32.totalorder %s1490_s29, %s1486_s28 }
   0xc   : > { %p165_p1 = scmp.eq.s32.totalorder %s164_s13, 0  ;;  %p175_p2 = scmp.eq.s32.totalorder %s1494_s30, 0 }
   0xd   : > { %p180_p3 = scmp.ne.s32.totalorder %s1486_s28, %s1482_s27  ;;  %p1895_p4 = scmp.eq.s32.totalorder %s1572_s9, 0 }
   0xe   : > { %s1588_s14 = scalar_select %p165_p1, %s1490_s29, %s167_s12  }
   0xf   : > { %p1590_p5 = por %p175_p2, %p174_p0  ;;  %p1596_p6 = por %p1895_p4, %p180_p3 }
  0x10   : > { %1905 = sst [smem:[#allocation16_spill]] %s1588_s14  ;;  %p204_p7 = scmp.eq.s32.totalorder %s1572_s9, 1 }
  0x11   : > { %s1907_s16 = scalar_select %p1596_p6, 1, 0 }
  0x12   : > { %p210_p8 = scmp.eq.s32.totalorder %s1105_s10, 1  ;;  %p1106_p9 = scmp.ge.s32.totalorder %s1494_s30, 1 }
  0x13   : > { %p243_p10 = scmp.lt.s32.totalorder %s1494_s30, 3  ;;  %p1603_p11 = por %p204_p7, %p174_p0 }
  0x14   : > { %p1607_p12 = por %p210_p8, %p180_p3  ;;  %s1496_s20 = smov [#allocation2]  }
  0x15   : > { %s1908_s17 = scalar_select %p1603_p11, 1, 0 }
  0x16   : > { %s1909_s18 = scalar_select %p1607_p12, 1, 0 }
  0x17   : > { %p1611_p13 = pnand %p1106_p9, %p243_p10  ;;  %s265_s21 = sshll.u32 %s1496_s20, 4  ;;  %s266_s21 = int_to_ptr.vmem [resolvable:$true] %s265_s21 }
  0x18   : > { %p1270_p4 = scmp.lt.s32.totalorder %s1494_s30, 2  ;;  %p1911_p0 = scmp.eq.s32.totalorder %s1572_s9, 0 }
  0x19   : > { %s1910_s19 = scalar_select %p1611_p13, 1, 0 }
  0x1a   : > { %p1254_p2 = pneg %p1611_p13  ;;  %s287_s23 = sand.u32 1, %s1490_s29  }
  0x1b   : > { %p1628_p3 = pnand %p1270_p4, %p1590_p5  ;;  %s1109_s25 = sshll.u32 %s287_s23, 6 }
  0x1c   : > { %p1621_p7 = pnand %p1254_p2, %p1911_p0  ;;  %s1334_s12 = scalar_lea.hbm %s1890_s4, 128 }
  0x1d   : > { %s1913_s24 = scalar_select %p1628_p3, 1, 0 }
  0x1e   : > { %p1335_p8 = scmp.ne.s32.totalorder %s1890_s4, %s1334_s12  ;;  %p1336_p9 = pneg %p1621_p7 }
  0x1f   : > { %p1341_p4 = scmp.lt.u32.totalorder %s1334_s12, %s1890_s4 }
  0x20   : > { %p1337_p10 = pnand %p1336_p9, %p1335_p8 }
  0x22   : > { %p1338_p2 = pneg %p1337_p10 }
  0x24   : > { %p1343_p5 = pnand %p1341_p4, %p1338_p2 }
  0x26   : > { %1346 = shalt.err (!%p1343_p5)
}
  0x27   : > { %s1347_s15 = scalar_lea.vmem %s266_s21, 128  ;;  %p1355_p11 = scmp.lt.s32.totalorder %s266_s21, %s266_s21 }
  0x28   : > { %p1348_p0 = scmp.ne.s32.totalorder %s266_s21, %s1347_s15  ;;  %p1356_p6 = scmp.lt.s32.totalorder %s1347_s15, %s1347_s15 }
  0x2a   : > { %p1350_p1 = pnand %p1348_p0, %p1336_p9  ;;  %p1357_p13 = por %p1356_p6, %p1355_p11 }
  0x2c   : > { %p1351_p12 = pneg %p1350_p1 }
  0x2e   : > { %p1358_p3 = pnand %p1357_p13, %p1351_p12 }
  0x30   : > { %1361 = shalt.err (!%p1358_p3)
}
  0x31   : > { %1257 = dma.hbm_to_vmem [thread:$0]  (!%p1621_p7), %s1890_s4, 128, %s266_s21, [#allocation3]  }
  0x32   : > { %s1140_s29 = sshll.u32 %s1494_s30, 10  ;;  %s291_s14 = scalar_lea.vmem [#allocation5], %s1109_s25 }
  0x33   : > { %s298_s12 = sshll.u32 %s291_s14, 4  ;;  %s1652_s11 = scalar_lea.hbm %s1892_s6, %s1140_s29  ;;  %s1654_s12 = int_to_ptr.vmem [resolvable:$true] %s298_s12 }
  0x34   : > { %s1656_s22 = scalar_lea.sflag [#allocation6], %s287_s23  ;;  %s1362_s15 = scalar_lea.hbm %s1652_s11, 1024 }
  0x35   : > { %p1363_p6 = scmp.ne.s32.totalorder %s1652_s11, %s1362_s15  ;;  %p1914_p11 = scmp.ne.s32.totalorder %s1913_s24, 0 }
  0x36   : > { %s1367_s26 = scalar_lea.hbm %s1892_s6, 2048  ;;  %p1368_p7 = scmp.lt.u32.totalorder %s1652_s11, %s1892_s6 }
  0x37   : > { %p1364_p12 = pneg %p1914_p11  ;;  %p1369_p3 = scmp.lt.u32.totalorder %s1367_s26, %s1362_s15 }
  0x38   : > { %p1371_p9 = scmp.lt.u32.totalorder %s1362_s15, %s1652_s11 }
  0x39   : > { %p1365_p13 = pnand %p1364_p12, %p1363_p6  ;;  %p1370_p8 = por %p1369_p3, %p1368_p7 }
  0x3b   : > { %p1366_p1 = pneg %p1365_p13  ;;  %p1372_p10 = por %p1371_p9, %p1370_p8 }
  0x3d   : > { %p1373_p2 = pnand %p1372_p10, %p1366_p1 }
  0x3f   : > { %1376 = shalt.err (!%p1373_p2)
}
  0x40   : > { %s1377_s23 = scalar_lea.vmem %s1654_s12, 1024  ;;  %s1497_s14 = smov [#allocation5]  }
  0x41   : > { %p1378_p4 = scmp.ne.s32.totalorder %s1654_s12, %s1377_s23  ;;  %s1382_s13 = sshll.u32 %s1497_s14, 4  ;;  %s1383_s13 = int_to_ptr.vmem [resolvable:$false] %s1382_s13 }
  0x42   : > { %s1384_s20 = scalar_lea.vmem %s1383_s13, 2048  ;;  %p1385_p6 = scmp.lt.s32.totalorder %s1654_s12, %s1383_s13 }
  0x43   : > { %p1380_p5 = pnand %p1378_p4, %p1364_p12  ;;  %p1386_p13 = scmp.lt.s32.totalorder %s1384_s20, %s1377_s23 }
  0x45   : > { %p1381_p0 = pneg %p1380_p5  ;;  %p1387_p7 = por %p1386_p13, %p1385_p6 }
  0x47   : > { %p1388_p3 = pnand %p1387_p7, %p1381_p0 }
  0x49   : > { %1391 = shalt.err (!%p1388_p3)
}
  0x4a   : > { %s1498_s15 = smov 512   ;;  %s1499_s21 = smov 32  }
  0x4b   : > { %1261 = dma.hbm_to_vmem [thread:$0]  (!%p1914_p11), %s1652_s11, 1024, %s1654_s12, %s1656_s22, %s1498_s15, %s1498_s15, %s1499_s21  }
  0x4c   : > { %p1915_p12 = scmp.ne.s32.totalorder %s1910_s19, 0 }
  0x4d   : > { %p1916_p1 = scmp.eq.s32.totalorder (!%p1915_p12), %s1572_s9, 0 }
  0x4e   : > { %310 = sbr.rel (%p1915_p12) target bundleno = 1501 (0x5dd), region = 48 }
  0x55   : > { %1465 = dma.done.wait (%p1916_p1), [#allocation3], 128   ;;  %p1917_p8 = pmov %p1916_p1 }
  0x56   : > { %s1691_s25 = sand.u32 1, %s1486_s28   ;;  %p1918_p11 = scmp.ne.s32.totalorder %s1907_s16, 0 }
  0x57   : > { %1467 = vsyncadd (%p1917_p8), [#allocation3], 4294967168  ;;  %s1114_s26 = sshll.u32 %s1691_s25, 6  ;;  %s317_s10 = scalar_lea.sflag [#allocation6], %s1691_s25 }
  0x58   : > { %s1695_s29 = scalar_lea.vmem [#allocation5], %s1114_s26 }
  0x59   : > { %1469 = dma.done.wait (%p1918_p11), %s317_s10, 1024  }
  0x5a   : > { %1471 = vsyncadd (%p1918_p11), %s317_s10, 4294966272  ;;  %p363_p9 = scmp.lt.s32.totalorder %s1572_s9, 1  ;;  %v370_v0 = vld [vmem:[%s1887_s1] sm:$0xff]  ;;  %v371_v1 = vld [vmem:[%s1887_s1 + $0x8] sm:$0xff]  ;;  %vm383_vm0 = vcmask 392192   ;;  %v1500_v11 = vmov 0.0|0.0   ;;  %v555_v41 = vlaneseq }
  0x5b   : > { %v372_v2 = vld [vmem:[%s1887_s1 + $0x10] sm:$0xff]  ;;  %v1208_v3 = vpack.c.bf16 %v371_v1, %v370_v0  ;;  %v373_v4 = vld [vmem:[%s1887_s1 + $0x18] sm:$0xff]  ;;  %v374_v6 = vld [vmem:[%s1887_s1 + $0x20] sm:$0xff]  ;;  %1220 = vmatprep.subr.bf16.mxu1 %v1500_v11  ;;  %vm1501_vm1 = vmmov 0   ;;  %v1502_v18 = vmov 0.0   ;;  %vm465_vm2 = vcmask 261120  }
  0x5c   : > { %s364_s11 = scalar_select %p363_p9, %s1572_s9, 1  ;;  %v1212_v5 = vpack.c.bf16 %v373_v4, %v372_v2  ;;  %v375_v7 = vld [vmem:[%s1887_s1 + $0x28] sm:$0xff]  ;;  %v477_v12 = vld [vmem:[%s1889_s3] sm:$0xff]  ;;  %v479_v15 = vld [vmem:[%s1889_s3 + $0x10] sm:$0xff]  ;;  %1187 = vmatprep.mubr.msk.f32.mxu1 %vm1501_vm1, %v1502_v18  ;;  %v556_v42 = vshrl.u32 %v555_v41, 7  ;;  %vm923_vm4 = vcmask 48128  }
  0x5d   : > { %1209 = vmatprep.subr.bf16.mxu0 %v1208_v3  ;;  %v1216_v9 = vpack.c.bf16 %v375_v7, %v374_v6  ;;  %v478_v13 = vld [vmem:[%s1889_s3 + $0x8] sm:$0xff]  ;;  %v480_v16 = vld [vmem:[%s1889_s3 + $0x18] sm:$0xff]  ;;  %v1119_v19 = vld [vmem:[%s1888_s2] ss:$0 sm:$0xff]  ;;  %s1503_s20 = smov 122   ;;  %vm726_vm5 = vcmask 130048  }
  0x5e   : > { %s1141_s19 = sshll.u32 %s364_s11, 4  ;;  %1211 = vmatpush3.bf16.msra.mxu0 %v1208_v3  ;;  %v1221_v14 = vpack.c.bf16 %v478_v13, %v477_v12  ;;  %v1224_v17 = vpack.c.bf16 %v480_v16, %v479_v15  ;;  %vm1234_vm3 = vmpackc.low %vm465_vm2, %vm465_vm2  ;;  %v560_v33 = vld [vmem:[%s1891_s5] sm:$0xff]  ;;  %v561_v34 = vld [vmem:[%s1891_s5 + $0x8] sm:$0xff]  ;;  %v557_v43 = vsub.s32 0, %v556_v42  ;;  %s1116_s15 = sshll.u32 %s1691_s25, 5 }
  0x5f   : > { %s367_s22 = scalar_lea.vmem %s1886_s0, %s1141_s19  ;;  %1213 = vmatprep.subr.bf16.mxu0 %v1212_v5  ;;  %v1227_v36 = vpack.c.bf16 %v561_v34, %v560_v33  ;;  %v562_v38 = vld [vmem:[%s1891_s5 + $0x10] sm:$0xff]  ;;  %v563_v39 = vld [vmem:[%s1891_s5 + $0x18] sm:$0xff]  ;;  %v554_v45 = vld [vmem:[#allocation2] sm:$0xff]  ;;  %s1142_s21 = sshll.u32 %s1572_s9, 9 }
  0x60   : > { %v368_v8 = vld [vmem:[%s367_s22] sm:$0xff]  ;;  %v369_v10 = vld [vmem:[%s367_s22 + $0x8] sm:$0xff]  ;;  %1222 = vmatpush3.bf16.msra.mxu1 %v1221_v14  ;;  %v1230_v40 = vpack.c.bf16 %v563_v39, %v562_v38  ;;  %v719_v52 = vld [vmem:[%s1695_s29 + $0x8] sm:$0xff]  ;;  %s1115_s22 = sshll.u32 %s1691_s25, 3  ;;  %s1812_s19 = scalar_lea.hbm %s1894_s8, %s1142_s21 }
  0x61   : > { %1176 = vmatprep.mubr.msk.f32.mxu0 %vm383_vm0, %v368_v8  ;;  %1223 = vmatprep.subr.bf16.mxu1 %v1500_v11  ;;  %v723_v53 = vld [vmem:[%s1695_s29 + $0x28] sm:$0xff]  ;;  %v718_v54 = vld [vmem:[%s1695_s29] sm:$0xff]  ;;  %v721_v57 = vld [vmem:[%s1695_s29 + $0x18] sm:$0xff]  ;;  %s1803_s16 = scalar_lea.vmem [#allocation7], %s1115_s22  ;;  %s952_s24 = scalar_lea.sflag [#allocation9], %s1691_s25 }
  0x62   : > { %1215 = vmatpush3.bf16.msra.mxu0 %v1212_v5  ;;  %v1236_v55 = vpack.c.bf16 %v723_v53, %v719_v52  ;;  %v722_v56 = vld [vmem:[%s1695_s29 + $0x20] sm:$0xff]  ;;  %v725_v58 = vld [vmem:[%s1695_s29 + $0x38] sm:$0xff]  ;;  %v720_v61 = vld [vmem:[%s1695_s29 + $0x10] sm:$0xff]  ;;  %935 = vst [vmem:[%s1803_s16] sm:$0xff] %v1502_v18  ;;  %p1919_p2 = scmp.ne.s32.totalorder %s1908_s17, 0  ;;  %s1504_s23 = smov [#allocation8]  }
  0x63   : > { %1217 = vmatprep.subr.bf16.mxu0 %v1216_v9  ;;  %v1238_v59 = vpack.c.bf16 %v722_v56, %v718_v54  ;;  %v1240_v60 = vpack.c.bf16 %v725_v58, %v721_v57  ;;  %v724_v62 = vld [vmem:[%s1695_s29 + $0x30] sm:$0xff]  ;;  %s1787_s29 = scalar_lea.vmem [#allocation8], %s1116_s15  ;;  %s1396_s14 = sshll.u32 %s1504_s23, 4  ;;  %s1397_s14 = int_to_ptr.vmem [resolvable:$false] %s1396_s14 }
  0x64   : > { %1225 = vmatpush3.bf16.msra.mxu1 %v1224_v17  ;;  %v1242_v63 = vpack.c.bf16 %v724_v62, %v720_v61  ;;  %s979_s26 = sshll.u32 %s1787_s29, 4  ;;  %s1398_s13 = scalar_lea.vmem %s1397_s14, 1024  ;;  %s980_s26 = int_to_ptr.vmem [resolvable:$true] %s979_s26 }
  0x65   : > { %1226 = vmatprep.subr.bf16.mxu1 %v1500_v11  ;;  %s1392_s12 = scalar_lea.vmem %s980_s26, 512  ;;  %p1399_p0 = scmp.lt.s32.totalorder %s980_s26, %s1397_s14 }
  0x66   : > { %1219 = vmatpush3.bf16.msra.mxu0 %v1216_v9  ;;  %p1393_p10 = scmp.ne.s32.totalorder %s980_s26, %s1392_s12  ;;  %p1400_p6 = scmp.lt.s32.totalorder %s1398_s13, %s1392_s12 }
  0x67   : > { %1232 = vmatprep.subr.bf16.mxu0 %v1500_v11 }
  0x68   : > { %p1394_p4 = pnand %p1393_p10, %p1919_p2  ;;  %p1401_p13 = por %p1400_p6, %p1399_p0 }
  0x69   : > { %1177 = vmatmul.mubr.msk.f32.vlgmr.msra.gmra.mrb[0].mxu0 %vm383_vm0, %v369_v10 }
  0x6a   : > { %1205 = vmatprep.mubr.msk.f32.mxu0 %vm1501_vm1, %v1502_v18  ;;  %p1395_p5 = pneg %p1394_p4 }
  0x6c   : > { %p1402_p7 = pnand %p1401_p13, %p1395_p5 }
 0x13c   : > { %v1178_v20 = vpop.f32.mrb[0].mxu0 }
 0x13d   : > { %v462_v21 = vadd.f32 %v1178_v20, %v1119_v19  ;;  %v456_v22 = vpop.f32.mrb[1].mxu0 }
 0x13e   : > { %v457_v23 = vadd.f32 %v1119_v19, %v456_v22 }
 0x13f   : > { %v467_v24 = vsel %vm465_vm2, %v462_v21, 0.0 }
 0x140   : > { %v466_v25 = vsel %vm465_vm2, %v457_v23, 0.0  ;;  %v1233_v26 = vpack.c.bf16 %v462_v21, %v457_v23 }
 0x141   : > { %v468_v27 = vadd.f32 %v467_v24, %v466_v25 }
 0x142   : > { %1235 = vmatpush3.bf16.xpose.msk.msra.mxu0 %vm1234_vm3, %v1233_v26 }
 0x143   : > { %v469_v28 = vrot.slane %v468_v27, 4  ;;  %1241 = vmatprep.subr.bf16.mxu0 %v1240_v60 }
 0x145   : > { %v470_v29 = vadd.f32 %v469_v28, %v468_v27 }
 0x147   : > { %v471_v30 = vrot.slane %v470_v29, 2 }
 0x149   : > { %v472_v31 = vadd.f32 %v471_v30, %v470_v29 }
 0x14b   : > { %v473_v32 = vrot.slane %v472_v31, 1 }
 0x14d   : > { %v474_v35 = vadd.f32 %v473_v32, %v472_v31 }
 0x14f   : > { %v476_v37 = vmul.f32 0.0625, %v474_v35 }
 0x151   : > { %1188 = vmatmul.mubr.msk.f32.vlgmr.msra.gmra.mrb[0].mxu1 %vm465_vm2, %v476_v37 }
 0x152   : > { %1228 = vmatpush3.bf16.msra.mxu1 %v1227_v36  ;;  %1198 = vmatprep.mubr.msk.f32.mxu1 %vm1501_vm1, %v1502_v18 }
 0x153   : > { %1229 = vmatprep.subr.bf16.mxu1 %v1500_v11 }
 0x156   : > { %1231 = vmatpush3.bf16.msra.mxu1 %v1230_v40 }
 0x157   : > { %1237 = vmatprep.subr.bf16.mxu1 %v1236_v55 }
 0x224   : > { %v550_v44 = vpop.f32.mrb[0].mxu1 }
 0x225   : > { %v558_v46 = vrot.slane %v550_v44, %v557_v43  ;;  %v1189_v47 = vpop.f32.mrb[1].mxu1 }
 0x227   : > { %v559_v48 = vadd.f32 %v558_v46, %v554_v45 }
 0x229   : > { %1199 = vmatmul.mubr.msk.f32.vlgmr.msra.gmra.mrb[2].mxu1 %vm465_vm2, %v559_v48 }
 0x22a   : > { %794 = vmatprep.mubr.f32.mxu1 %v1502_v18  ;;  %1239 = vmatpush1.bf16.msra.mxu1 %v1238_v59 }
 0x2fc   : > { %v1766_v49 = vpop.f32.mrb[2].mxu1 }
 0x2fd   : > { %638 = vrot.lane.b32.xlu0 %v1766_v49, %s1503_s20  ;;  %v1200_v50 = vpop.f32.mrb[3].mxu1  ;;  %v924_v51 = vsel %vm923_vm4, %v1766_v49, -inf }
 0x31c   : > { %925 = vmax.xlane.f32.xlu0 %v924_v51 }
 0x36f   : > { %v639_v0 = vpop.permute.xlu0 %638 }
 0x370   : > { %1206 = vmatmul.mubr.msk.f32.vlgmr.msra.gmra.mrb[2].mxu0 %vm465_vm2, %v639_v0 }
 0x371   : > { %1243 = vmatpush1.bf16.msra.mxu0 %v1242_v63  ;;  %865 = vmatprep.mubr.f32.mxu0 %v1502_v18 }
 0x3a9   : > { %v926_v3 = vpop.xlane.xlu0 %925 }
 0x3aa   : > { %v927_v4 = vsub.f32 %v1766_v49, %v926_v3 }
 0x3ac   : > { %v928_v5 = vmul.f32 1.442695, %v927_v4 }
 0x3ae   : > { %1312 = vpow2.f32 %v928_v5 }
 0x3b8   : > { %v1797_v27 = vpop.eup %1312 }
 0x3b9   : > { %v930_v28 = vsel %vm923_vm4, %v1797_v27, 0.0 }
 0x443   : > { %v714_v1 = vpop.f32.mrb[2].mxu0 }
 0x444   : > { %v1207_v2 = vpop.f32.mrb[3].mxu0  ;;  %1127 = vmatmul.mubr.msk.f32.vlgmr.msra.gmra.mrb[4].mxu1 %vm726_vm5, %v714_v1  ;;  %1128 = vmatmul.mubr.msk.f32.vlgmr.msra.gmra.mrb[4].mxu0 %vm726_vm5, %v714_v1 }
 0x517   : > { %v796_v6 = vpop.f32.mrb[4].mxu1  ;;  %v867_v7 = vpop.f32.mrb[4].mxu0 }
 0x518   : > { %vm872_vm6 = vcmp.gt.f32.partialorder %v796_v6, 0.0  ;;  %v884_v8 = vsub.f32 0.0, %v796_v6  ;;  %vm874_vm7 = vcmp.gt.f32.partialorder %v867_v7, 0.0  ;;  %v886_v9 = vsub.f32 0.0, %v867_v7  ;;  %v798_v10 = vpop.f32.mrb[5].mxu1  ;;  %v869_v11 = vpop.f32.mrb[5].mxu0 }
 0x519   : > { %v1129_v12 = vsel %vm872_vm6, 1.0, %v1502_v18  ;;  %v1131_v13 = vsel %vm874_vm7, 1.0, %v1502_v18  ;;  %vm873_vm8 = vcmp.gt.f32.partialorder %v798_v10, 0.0  ;;  %v885_v14 = vsub.f32 0.0, %v798_v10 }
 0x51a   : > { %v888_v15 = vmul.f32 1.442695, %v884_v8  ;;  %942 = vst [vmem:[%s1787_s29] sm:$0xff] %v1129_v12  ;;  %v892_v16 = vmul.f32 1.442695, %v886_v9  ;;  %944 = vst [vmem:[%s1787_s29 + $0x10] sm:$0xff] %v1131_v13  ;;  %v1130_v17 = vsel %vm873_vm8, 1.0, %v1502_v18 }
 0x51b   : > { %vm875_vm9 = vcmp.gt.f32.partialorder %v869_v11, 0.0  ;;  %v890_v19 = vmul.f32 1.442695, %v885_v14  ;;  %v914_v20 = vadd.f32 %v1130_v17, %v1129_v12  ;;  %943 = vst [vmem:[%s1787_s29 + $0x8] sm:$0xff] %v1130_v17  ;;  %v887_v22 = vsub.f32 0.0, %v869_v11 }
 0x51c   : > { %v1132_v21 = vsel %vm875_vm9, 1.0, %v1502_v18  ;;  %1314 = vpow2.f32 %v888_v15 }
 0x51d   : > { %945 = vst.msk [vmem:[%s1787_s29 + $0x18] sm:$0xff] %vm726_vm5, %v1132_v21  ;;  %1316 = vpow2.f32 %v892_v16  ;;  %v894_v23 = vmul.f32 1.442695, %v887_v22  ;;  %v915_v24 = vadd.f32 %v1131_v13, %v914_v20  ;;  %v916_v25 = vsel %vm726_vm5, %v1132_v21, 0.0 }
 0x51e   : > { %1318 = vpow2.f32 %v890_v19 }
 0x51f   : > { %1320 = vpow2.f32 %v894_v23  ;;  %v917_v26 = vadd.f32 %v916_v25, %v915_v24 }
 0x521   : > { %918 = vadd.xlane.f32.xlu1 %v917_v26 }
 0x525   : > { %931 = vadd.xlane.f32.xlu1 %v930_v28 }
 0x526   : > { %v1315_v29 = vpop.eup %1314 }
 0x527   : > { %v1317_v30 = vpop.eup %1316  ;;  %v896_v31 = vadd.f32 1.0, %v1315_v29 }
 0x528   : > { %v1319_v32 = vpop.eup %1318  ;;  %v898_v33 = vadd.f32 1.0, %v1317_v30 }
 0x529   : > { %v1321_v34 = vpop.eup %1320  ;;  %1322 = vrcp.f32 %v896_v31  ;;  %v897_v35 = vadd.f32 1.0, %v1319_v32 }
 0x52a   : > { %1324 = vrcp.f32 %v898_v33  ;;  %v899_v36 = vadd.f32 1.0, %v1321_v34 }
 0x52b   : > { %1326 = vrcp.f32 %v897_v35 }
 0x52c   : > { %1328 = vrcp.f32 %v899_v36 }
 0x533   : > { %v1323_v37 = vpop.eup %1322 }
 0x534   : > { %v1325_v38 = vpop.eup %1324  ;;  %v904_v39 = vmul.f32 %v1323_v37, %v1129_v12 }
 0x535   : > { %v1327_v40 = vpop.eup %1326  ;;  %v906_v44 = vmul.f32 %v1325_v38, %v1131_v13 }
 0x536   : > { %v1329_v41 = vpop.eup %1328  ;;  %v905_v42 = vmul.f32 %v1327_v40, %v1130_v17 }
 0x537   : > { %v907_v43 = vmul.f32 %v1329_v41, %v1132_v21 }
 0x538   : > { %v908_v45 = vadd.f32 %v905_v42, %v904_v39 }
 0x539   : > { %v910_v47 = vsel %vm726_vm5, %v907_v43, 0.0 }
 0x53a   : > { %v909_v46 = vadd.f32 %v908_v45, %v906_v44 }
 0x53c   : > { %v911_v48 = vadd.f32 %v910_v47, %v909_v46 }
 0x53e   : > { %912 = vadd.xlane.f32.xlu1 %v911_v48 }
 0x53f   : > { %1405 = shalt.err (!%p1402_p7)
}
 0x540   : > { %s1406_s20 = scalar_lea.hbm %s1812_s19, 512  ;;  %s1410_s22 = scalar_lea.hbm %s1894_s8, 1024 }
 0x541   : > { %p1407_p3 = scmp.ne.s32.totalorder %s1812_s19, %s1406_s20  ;;  %p1411_p8 = scmp.lt.u32.totalorder %s1812_s19, %s1894_s8 }
 0x542   : > { %p1412_p11 = scmp.lt.u32.totalorder %s1410_s22, %s1406_s20  ;;  %p1414_p10 = scmp.lt.u32.totalorder %s1406_s20, %s1812_s19 }
 0x543   : > { %p1408_p12 = pnand %p1407_p3, %p1919_p2 }
 0x544   : > { %p1413_p9 = por %p1412_p11, %p1411_p8 }
 0x545   : > { %p1409_p1 = pneg %p1408_p12 }
 0x546   : > { %p1415_p4 = por %p1414_p10, %p1413_p9 }
 0x548   : > { %p1416_p5 = pnand %p1415_p4, %p1409_p1 }
 0x54a   : > { %1419 = shalt.err (!%p1416_p5)
}
 0x54b   : > { %1251 = dma.vmem_to_hbm [thread:$0]  (%p1919_p2), %s980_s26, 512, %s1812_s19, %s952_s24   ;;  %vm936_vm10 = vcmask 39936   ;;  %vm938_vm11 = vcmask 48168   ;;  %vm940_vm12 = vcmask 310320  }
 0x54c   : > { %s1135_s11 = sshll.u32 %s1572_s9, 7  ;;  %s965_s12 = sshll.u32 %s1803_s16, 4  ;;  %s1841_s12 = int_to_ptr.vmem [resolvable:$true] %s965_s12 }
 0x54d   : > { %s1839_s24 = scalar_lea.hbm %s1893_s7, %s1135_s11  ;;  %s947_s9 = scalar_lea.sflag [#allocation4], %s1691_s25 }
 0x54e   : > { %s1420_s23 = scalar_lea.vmem %s1841_s12, 128  ;;  %s1505_s14 = smov [#allocation7]  }
 0x54f   : > { %p1421_p0 = scmp.ne.s32.totalorder %s1841_s12, %s1420_s23  ;;  %s1424_s13 = sshll.u32 %s1505_s14, 4  ;;  %s1425_s13 = int_to_ptr.vmem [resolvable:$false] %s1424_s13 }
 0x550   : > { %s1426_s20 = scalar_lea.vmem %s1425_s13, 256  ;;  %p1427_p7 = scmp.lt.s32.totalorder %s1841_s12, %s1425_s13 }
 0x551   : > { %p1422_p6 = pnand %p1421_p0, %p1919_p2  ;;  %p1428_p3 = scmp.lt.s32.totalorder %s1426_s20, %s1420_s23 }
 0x553   : > { %p1423_p13 = pneg %p1422_p6  ;;  %p1429_p12 = por %p1428_p3, %p1427_p7 }
 0x555   : > { %p1430_p1 = pnand %p1429_p12, %p1423_p13 }
 0x5ae   : > { %v919_v18 = vpop.xlane.xlu1 %918 }
 0x5af   : > { %v920_v52 = vadd.f32 1e-06, %v919_v18 }
 0x5b2   : > { %v932_v50 = vpop.xlane.xlu1 %931 }
 0x5b3   : > { %1330 = vrcp.f32 %v932_v50 }
 0x5b4   : > { %1332 = vrcp.f32 %v920_v52 }
 0x5bd   : > { %v1331_v51 = vpop.eup %1330 }
 0x5be   : > { %v934_v53 = vmul.f32 %v1331_v51, %v1797_v27  ;;  %v1333_v54 = vpop.eup %1332 }
 0x5c0   : > { %937 = vst.msk [vmem:[%s1803_s16] sm:$0xff] %vm936_vm10, %v934_v53 }
 0x5cb   : > { %v913_v55 = vpop.xlane.xlu1 %912 }
 0x5cc   : > { %v922_v56 = vmul.f32 %v1333_v54, %v913_v55 }
 0x5ce   : > { %939 = vst.msk [vmem:[%s1803_s16] sm:$0xff] %vm938_vm11, %v922_v56 }
 0x5cf   : > { %941 = vst.msk [vmem:[%s1803_s16] sm:$0xff] %vm940_vm12, %v1766_v49 }
 0x5d0   : > { %1433 = shalt.err (!%p1430_p1)
}
 0x5d1   : > { %s1434_s25 = scalar_lea.hbm %s1839_s24, 128  ;;  %s1438_s29 = scalar_lea.hbm %s1893_s7, 256 }
 0x5d2   : > { %p1435_p8 = scmp.ne.s32.totalorder %s1839_s24, %s1434_s25  ;;  %p1439_p10 = scmp.lt.u32.totalorder %s1839_s24, %s1893_s7 }
 0x5d3   : > { %p1440_p4 = scmp.lt.u32.totalorder %s1438_s29, %s1434_s25  ;;  %p1442_p0 = scmp.lt.u32.totalorder %s1434_s25, %s1839_s24 }
 0x5d4   : > { %p1436_p11 = pnand %p1435_p8, %p1919_p2 }
 0x5d5   : > { %p1441_p5 = por %p1440_p4, %p1439_p10 }
 0x5d6   : > { %p1437_p9 = pneg %p1436_p11 }
 0x5d7   : > { %p1443_p6 = por %p1442_p0, %p1441_p5 }
 0x5d9   : > { %p1444_p13 = pnand %p1443_p6, %p1437_p9 }
 0x5db   : > { %1447 = shalt.err (!%p1444_p13)
}
 0x5dc   : > { %1250 = dma.vmem_to_hbm [thread:$0]  (%p1919_p2), %s1841_s12, 128, %s1839_s24, %s947_s9  }
 0x5dd PF: > { %s991_s10 = sand.u32 1, %s1482_s27   ;;  %p1920_p7 = scmp.ne.s32.totalorder %s1909_s18, 0 }
 0x5de   : > { %p1921_p3 = scmp.ge.s32.totalorder %s1494_s30, 2  ;;  %s992_s11 = scalar_lea.sflag [#allocation4], %s991_s10 }
 0x5e0   : > { %p1263_p12 = pnand %p1921_p3, %p1920_p7 }
 0x5e2   : > { %1473 = dma.done.wait (!%p1263_p12), %s992_s11, 128  }
 0x5e3   : > { %1475 = vsyncadd (!%p1263_p12), %s992_s11, 4294967168  ;;  %s1001_s26 = scalar_lea.sflag [#allocation9], %s991_s10 }
 0x5e4   : > { %1477 = dma.done.wait (!%p1263_p12), %s1001_s26, 512  }
 0x5e5   : > { %1479 = vsyncadd (!%p1263_p12), %s1001_s26, 4294966784  ;;  %s1922_s30 = sld [smem:[#allocation15_spill]]  ;;  %s1923_s17 = sld [smem:[#allocation14_spill]] }
 0x5e6   : > { %s1924_s29 = sld [smem:[#allocation16_spill]]  ;;  %s1925_s27 = smov %s1486_s28 }
 0x5eb   : > { %p26_p2 = scmp.ge.s32.totalorder %s1922_s30, 4   ;;  %s1926_s28 = smov %s1923_s17 }
 0x5ed   :  { %28 = sbr.rel (!%p26_p2) target bundleno = 8 (0x8), region = 118 }
 0x5f4   :  { %1006 = vsyncpa [#allocation3], 1 }
 0x5f5   :  { %1008 = vsyncpa [#allocation3 + $0x1], 1 }
 0x5f6   :  { %1009 = vsyncpa [#allocation6], 1 }
 0x5f7   :  { %1011 = vsyncpa [#allocation6 + $0x1], 1 }
 0x5f8   :  { %1012 = vsyncpa [#allocation4], 1 }
 0x5f9   :  { %1014 = vsyncpa [#allocation4 + $0x1], 1 }
 0x5fa   :  { %1015 = vsyncpa [#allocation9], 1 }
 0x5fb   :  { %1017 = vsyncpa [#allocation9 + $0x1], 1 }

</bundles_post_ra>
